<compile_context>
chip_gen: v5e
topology: v5e:2x2
jax: 0.10.0
libtpu: 0.0.40
codegen_flags: <defaults>
</compile_context>

<pallas_src>
import functools

import jax
import jax.numpy as jnp
from jax import lax
from jax.experimental import pallas as pl
from jax.experimental.pallas import tpu as pltpu

# Fuzzy membership parameters (fixed in the reference module).
FMF_A, FMF_B, FMF_C, FMF_D = 0.0, 0.3, 0.7, 1.0
INV_BA = 1.0 / (FMF_B - FMF_A)   # precomputed reciprocals: activation is pure VALU
INV_DC = 1.0 / (FMF_D - FMF_C)


def _round_up(x, m):
    return (x + m - 1) // m * m


def _fuzzy_conv_kernel(x_ref, w_ref, b_ref, o_ref, patch_ref, *,
                       offsets, tile_p, cp, n_pt):
    """One (batch, spatial-tile) step: implicit-im2col slab + single MXU dot.

    x_ref:     (1, Cp, Sp)      bf16  whole flattened (padded) image, lanes = H*W
    w_ref:     (OCp, K)         bf16  folded weights, K = KH*KW*Cp
    b_ref:     (OCp, 1)         f32   bias
    o_ref:     (1, OCp, TILE_P) bf16  dense stride-1 conv + activation tile
    patch_ref: (K, TILE_P)      bf16  scratch: stacked shifted slices
    """
    if n_pt == 1:
        base = 0                     # fully static slicing on the single-tile path
    else:
        base = pl.multiple_of(pl.program_id(1) * tile_p, 128)

    # Build the implicit-im2col slab: tap t occupies sublanes [t*Cp, (t+1)*Cp)
    # (Cp is a multiple of the bf16 sublane tile, so every write is tile-aligned).
    for t, off in enumerate(offsets):
        patch_ref[t * cp:(t + 1) * cp, :] = x_ref[0, :, pl.ds(base + off, tile_p)]

    # Single MXU contraction over K = KH*KW*Cp, f32 accumulation.
    y = jnp.dot(w_ref[...], patch_ref[...], preferred_element_type=jnp.float32)
    y = y + b_ref[...]                                   # (OCp, 1) -> lanes

    # Trapezoidal fuzzy membership, matching the PyTorch module exactly
    # (the module does NOT clamp at 1, so y in (b, c) maps above 1).
    left = (y - FMF_A) * INV_BA
    right = (FMF_D - y) * INV_DC
    o_ref[0, :, :] = jnp.maximum(jnp.minimum(left, right), 0.0).astype(o_ref.dtype)


def fuzzy_conv2d(x, weight, bias, *, stride=1, padding=0,
                 max_tile_p=2048, out_dtype=jnp.bfloat16):
    """FuzzyConv2d forward.  x: [N, C, H, W] (NCHW), weight: [OC, C, KH, KW]."""
    # TODO(synk): dilation > 1 and groups > 1 (nn.Conv2d options) not implemented;
    #             module defaults (1, 1) only.
    # TODO(synk): stride > 1 still computes the dense (stride-1) conv and
    #             subsamples host-side instead of computing strided outputs directly.
    N, C, H, W = x.shape
    OC, Cw, KH, KW = weight.shape
    assert Cw == C

    Hp, Wp = H + 2 * padding, W + 2 * padding
    OHd = Hp - KH + 1                  # dense (stride-1) output extents
    OWd = Wp - KW + 1

    SUB = 16                           # bf16 sublane tile
    Cp = _round_up(C, SUB)
    OCp = _round_up(OC, SUB)
    K = KH * KW * Cp                   # folded contraction length

    P_raw = OHd * Wp                   # flattened dense output width (incl. seams)
    TILE_P = min(_round_up(P_raw, 128), max_tile_p)
    Pp = _round_up(P_raw, TILE_P)
    n_pt = Pp // TILE_P
    max_off = (KH - 1) * Wp + (KW - 1)
    Sp = _round_up(Pp + max_off, 128)  # input lane width incl. shift headroom

    # ---- host-side glue (cheap; fuses under jit; no 9x im2col) ---------------
    xb = x.astype(jnp.bfloat16)
    xp = jnp.pad(xb, ((0, 0), (0, Cp - C),
                      (padding, padding), (padding, padding)))
    xs = xp.reshape(N, Cp, Hp * Wp)
    xs = jnp.pad(xs, ((0, 0), (0, 0), (0, Sp - Hp * Wp)))

    # (OC, C, KH, KW) -> folded (OCp, KH*KW*Cp): tap-major, channel-minor,
    # matching the patch-slab layout built in the kernel.
    w_r = weight.transpose(0, 2, 3, 1)                          # (OC, KH, KW, C)
    w_r = jnp.pad(w_r, ((0, OCp - OC), (0, 0), (0, 0), (0, Cp - C)))
    w_r = w_r.reshape(OCp, K).astype(jnp.bfloat16)
    b_r = jnp.pad(bias, (0, OCp - OC)).astype(jnp.float32).reshape(OCp, 1)

    offsets = tuple(i * Wp + j for i in range(KH) for j in range(KW))
    kernel = functools.partial(_fuzzy_conv_kernel, offsets=offsets,
                               tile_p=TILE_P, cp=Cp, n_pt=n_pt)

    out_itemsize = jnp.dtype(out_dtype).itemsize
    flops = 2 * N * OCp * Pp * K       # dense work actually performed
    bytes_accessed = (xs.size * 2 + w_r.size * 2 + b_r.size * 4
                      + N * OCp * Pp * out_itemsize)

    vmem_needed = (2 * (Cp * Sp * 2 + OCp * K * 2 + OCp * 4
                        + OCp * TILE_P * out_itemsize)
                   + K * TILE_P * 2)
    vmem_limit = int(min(96 * 1024 * 1024,
                         max(32 * 1024 * 1024, 2 * vmem_needed)))

    # TODO(synk): for very large C*H*W the whole-image input block no longer fits
    #             VMEM; switch the input to memory_space=pl.ANY + halo'd manual DMA.
    out = pl.pallas_call(
        kernel,
        out_shape=jax.ShapeDtypeStruct((N, OCp, Pp), out_dtype),
        grid_spec=pltpu.PrefetchScalarGridSpec(
            num_scalar_prefetch=0,
            grid=(N, n_pt),
            in_specs=[
                pl.BlockSpec((1, Cp, Sp), lambda n, j: (n, 0, 0)),
                pl.BlockSpec((OCp, K), lambda n, j: (0, 0)),
                pl.BlockSpec((OCp, 1), lambda n, j: (0, 0)),
            ],
            out_specs=pl.BlockSpec((1, OCp, TILE_P), lambda n, j: (n, 0, j)),
            scratch_shapes=[pltpu.VMEM((K, TILE_P), jnp.bfloat16)],
        ),
        compiler_params=pltpu.CompilerParams(
            dimension_semantics=("parallel", "parallel"),
            vmem_limit_bytes=vmem_limit),
        cost_estimate=pl.CostEstimate(
            flops=flops, bytes_accessed=bytes_accessed, transcendentals=0),
    )(xs, w_r, b_r)

    # ---- unpack: drop OC/lane padding + seam columns, apply stride -----------
    dense = out[:, :OC, :P_raw].reshape(N, OC, OHd, Wp)[:, :, :, :OWd]
    return dense[:, :, ::stride, ::stride]


def _reference_fuzzy_conv2d(x, weight, bias, *, stride=1, padding=0):
    """Pure-JAX f32 reference (lax conv + fmf) for correctness checking."""
    y = lax.conv_general_dilated(
        x.astype(jnp.float32), weight.astype(jnp.float32),
        window_strides=(stride, stride),
        padding=[(padding, padding), (padding, padding)],
        dimension_numbers=("NCHW", "OIHW", "NCHW"))
    y = y + bias.reshape(1, -1, 1, 1)
    left = (y - FMF_A) / (FMF_B - FMF_A)
    right = (FMF_D - y) / (FMF_D - FMF_C)
    return jnp.maximum(jnp.minimum(left, right), 0.0)


if __name__ == "__main__":
    # Small shapes consistent with the module: N=2, C_in=4, H=W=16,
    # C_out=8, kernel_size=3, stride=1, padding=1.
    key = jax.random.PRNGKey(0)
    kx, kw, kb = jax.random.split(key, 3)

    N, C_in, H, W = 2, 4, 16, 16
    C_out, KH, KW = 8, 3, 3
    stride, padding = 1, 1

    x = jax.random.normal(kx, (N, C_in, H, W), dtype=jnp.float32)

    # Deterministic PyTorch-style Conv2d init: U(-sqrt(k), sqrt(k)),
    # k = 1 / (C_in * KH * KW).
    fan_in = C_in * KH * KW
    bound = 1.0 / (fan_in ** 0.5)
    weight = jax.random.uniform(
        kw, (C_out, C_in, KH, KW), minval=-bound, maxval=bound,
        dtype=jnp.float32)
    bias = jax.random.uniform(
        kb, (C_out,), minval=-bound, maxval=bound, dtype=jnp.float32)

    fwd = jax.jit(functools.partial(fuzzy_conv2d, stride=stride,
                                    padding=padding))
    out = jax.block_until_ready(fwd(x, weight, bias))

    ref = _reference_fuzzy_conv2d(x, weight, bias, stride=stride,
                                  padding=padding)
    assert out.shape == ref.shape == (N, C_out, H, W)
    max_err = float(jnp.max(jnp.abs(out.astype(jnp.float32) - ref)))
    # bf16 MXU operands + bf16 output store vs pure-f32 reference.
    assert max_err < 4e-2, f"mismatch vs reference: max abs err {max_err}"

    print("KERNEL_OK")
</pallas_src>

<mosaic_0001>
module attributes {stable_mosaic.version = 11 : i64} {
  func.func @_fuzzy_conv_kernel(%arg0: i32, %arg1: i32, %arg2: memref<1x16x512xbf16, #tpu.memory_space<vmem>>, %arg3: memref<16x144xbf16, #tpu.memory_space<vmem>>, %arg4: memref<16x1xf32, #tpu.memory_space<vmem>>, %arg5: memref<1x16x384xbf16, #tpu.memory_space<vmem>>, %arg6: memref<144x384xbf16, #tpu.memory_space<vmem>>) attributes {dimension_semantics = [#tpu.dimension_semantics<parallel>, #tpu.dimension_semantics<parallel>], iteration_bounds = array<i64: 2, 1>, scalar_prefetch = 0 : i64, scratch_operands = 1 : i64, tpu.core_type = #tpu.core_type<tc>, window_params = [{transform_indices = @transform_0, window_bounds = array<i64: 1, 16, 512>}, {pipeline_mode = #tpu.pipeline_mode<synchronous>, transform_indices = @transform_1, window_bounds = array<i64: 16, 144>}, {pipeline_mode = #tpu.pipeline_mode<synchronous>, transform_indices = @transform_2, window_bounds = array<i64: 16, 1>}, {transform_indices = @transform_3, window_bounds = array<i64: 1, 16, 384>}]} {
    %c0 = arith.constant 0 : index
    %c0_0 = arith.constant 0 : index
    %c0_1 = arith.constant 0 : index
    %0 = vector.load %arg2[%c0, %c0_0, %c0_1] : memref<1x16x512xbf16, #tpu.memory_space<vmem>>, vector<1x16x384xbf16>
    %1 = vector.shape_cast %0 : vector<1x16x384xbf16> to vector<16x384xbf16>
    %c0_2 = arith.constant 0 : index
    %c0_3 = arith.constant 0 : index
    %2 = vector.load %arg6[%c0_2, %c0_3] : memref<144x384xbf16, #tpu.memory_space<vmem>>, vector<16x384xbf16>
    tpu.vector_store %arg6[%c0_2, %c0_3], %1 {strides = array<i32>} : memref<144x384xbf16, #tpu.memory_space<vmem>>, vector<16x384xbf16>,
    %c0_4 = arith.constant 0 : index
    %c0_5 = arith.constant 0 : index
    %c1 = arith.constant 1 : index
    %3 = vector.load %arg2[%c0_4, %c0_5, %c1] : memref<1x16x512xbf16, #tpu.memory_space<vmem>>, vector<1x16x384xbf16>
    %4 = vector.shape_cast %3 : vector<1x16x384xbf16> to vector<16x384xbf16>
    %c16 = arith.constant 16 : index
    %c0_6 = arith.constant 0 : index
    %5 = vector.load %arg6[%c16, %c0_6] : memref<144x384xbf16, #tpu.memory_space<vmem>>, vector<16x384xbf16>
    tpu.vector_store %arg6[%c16, %c0_6], %4 {strides = array<i32>} : memref<144x384xbf16, #tpu.memory_space<vmem>>, vector<16x384xbf16>,
    %c0_7 = arith.constant 0 : index
    %c0_8 = arith.constant 0 : index
    %c2 = arith.constant 2 : index
    %6 = vector.load %arg2[%c0_7, %c0_8, %c2] : memref<1x16x512xbf16, #tpu.memory_space<vmem>>, vector<1x16x384xbf16>
    %7 = vector.shape_cast %6 : vector<1x16x384xbf16> to vector<16x384xbf16>
    %c32 = arith.constant 32 : index
    %c0_9 = arith.constant 0 : index
    %8 = vector.load %arg6[%c32, %c0_9] : memref<144x384xbf16, #tpu.memory_space<vmem>>, vector<16x384xbf16>
    tpu.vector_store %arg6[%c32, %c0_9], %7 {strides = array<i32>} : memref<144x384xbf16, #tpu.memory_space<vmem>>, vector<16x384xbf16>,
    %c0_10 = arith.constant 0 : index
    %c0_11 = arith.constant 0 : index
    %c18 = arith.constant 18 : index
    %9 = vector.load %arg2[%c0_10, %c0_11, %c18] : memref<1x16x512xbf16, #tpu.memory_space<vmem>>, vector<1x16x384xbf16>
    %10 = vector.shape_cast %9 : vector<1x16x384xbf16> to vector<16x384xbf16>
    %c48 = arith.constant 48 : index
    %c0_12 = arith.constant 0 : index
    %11 = vector.load %arg6[%c48, %c0_12] : memref<144x384xbf16, #tpu.memory_space<vmem>>, vector<16x384xbf16>
    tpu.vector_store %arg6[%c48, %c0_12], %10 {strides = array<i32>} : memref<144x384xbf16, #tpu.memory_space<vmem>>, vector<16x384xbf16>,
    %c0_13 = arith.constant 0 : index
    %c0_14 = arith.constant 0 : index
    %c19 = arith.constant 19 : index
    %12 = vector.load %arg2[%c0_13, %c0_14, %c19] : memref<1x16x512xbf16, #tpu.memory_space<vmem>>, vector<1x16x384xbf16>
    %13 = vector.shape_cast %12 : vector<1x16x384xbf16> to vector<16x384xbf16>
    %c64 = arith.constant 64 : index
    %c0_15 = arith.constant 0 : index
    %14 = vector.load %arg6[%c64, %c0_15] : memref<144x384xbf16, #tpu.memory_space<vmem>>, vector<16x384xbf16>
    tpu.vector_store %arg6[%c64, %c0_15], %13 {strides = array<i32>} : memref<144x384xbf16, #tpu.memory_space<vmem>>, vector<16x384xbf16>,
    %c0_16 = arith.constant 0 : index
    %c0_17 = arith.constant 0 : index
    %c20 = arith.constant 20 : index
    %15 = vector.load %arg2[%c0_16, %c0_17, %c20] : memref<1x16x512xbf16, #tpu.memory_space<vmem>>, vector<1x16x384xbf16>
    %16 = vector.shape_cast %15 : vector<1x16x384xbf16> to vector<16x384xbf16>
    %c80 = arith.constant 80 : index
    %c0_18 = arith.constant 0 : index
    %17 = vector.load %arg6[%c80, %c0_18] : memref<144x384xbf16, #tpu.memory_space<vmem>>, vector<16x384xbf16>
    tpu.vector_store %arg6[%c80, %c0_18], %16 {strides = array<i32>} : memref<144x384xbf16, #tpu.memory_space<vmem>>, vector<16x384xbf16>,
    %c0_19 = arith.constant 0 : index
    %c0_20 = arith.constant 0 : index
    %c36 = arith.constant 36 : index
    %18 = vector.load %arg2[%c0_19, %c0_20, %c36] : memref<1x16x512xbf16, #tpu.memory_space<vmem>>, vector<1x16x384xbf16>
    %19 = vector.shape_cast %18 : vector<1x16x384xbf16> to vector<16x384xbf16>
    %c96 = arith.constant 96 : index
    %c0_21 = arith.constant 0 : index
    %20 = vector.load %arg6[%c96, %c0_21] : memref<144x384xbf16, #tpu.memory_space<vmem>>, vector<16x384xbf16>
    tpu.vector_store %arg6[%c96, %c0_21], %19 {strides = array<i32>} : memref<144x384xbf16, #tpu.memory_space<vmem>>, vector<16x384xbf16>,
    %c0_22 = arith.constant 0 : index
    %c0_23 = arith.constant 0 : index
    %c37 = arith.constant 37 : index
    %21 = vector.load %arg2[%c0_22, %c0_23, %c37] : memref<1x16x512xbf16, #tpu.memory_space<vmem>>, vector<1x16x384xbf16>
    %22 = vector.shape_cast %21 : vector<1x16x384xbf16> to vector<16x384xbf16>
    %c112 = arith.constant 112 : index
    %c0_24 = arith.constant 0 : index
    %23 = vector.load %arg6[%c112, %c0_24] : memref<144x384xbf16, #tpu.memory_space<vmem>>, vector<16x384xbf16>
    tpu.vector_store %arg6[%c112, %c0_24], %22 {strides = array<i32>} : memref<144x384xbf16, #tpu.memory_space<vmem>>, vector<16x384xbf16>,
    %c0_25 = arith.constant 0 : index
    %c0_26 = arith.constant 0 : index
    %c38 = arith.constant 38 : index
    %24 = vector.load %arg2[%c0_25, %c0_26, %c38] : memref<1x16x512xbf16, #tpu.memory_space<vmem>>, vector<1x16x384xbf16>
    %25 = vector.shape_cast %24 : vector<1x16x384xbf16> to vector<16x384xbf16>
    %c128 = arith.constant 128 : index
    %c0_27 = arith.constant 0 : index
    %26 = vector.load %arg6[%c128, %c0_27] : memref<144x384xbf16, #tpu.memory_space<vmem>>, vector<16x384xbf16>
    tpu.vector_store %arg6[%c128, %c0_27], %25 {strides = array<i32>} : memref<144x384xbf16, #tpu.memory_space<vmem>>, vector<16x384xbf16>,
    %c0_28 = arith.constant 0 : index
    %c0_29 = arith.constant 0 : index
    %27 = vector.load %arg3[%c0_28, %c0_29] : memref<16x144xbf16, #tpu.memory_space<vmem>>, vector<16x144xbf16>
    %c0_30 = arith.constant 0 : index
    %c0_31 = arith.constant 0 : index
    %28 = vector.load %arg6[%c0_30, %c0_31] : memref<144x384xbf16, #tpu.memory_space<vmem>>, vector<144x384xbf16>
    %cst = arith.constant dense<0.000000e+00> : vector<16x384xf32>
    %29 = tpu.matmul %27, %28, %cst {dimension_numbers = #tpu.dot_dimension_numbers<[1], [0], [0], [1], [0, 0, 1, 1], [], []>} : vector<16x144xbf16>, vector<144x384xbf16>, vector<16x384xf32> -> vector<16x384xf32>
    %c0_32 = arith.constant 0 : index
    %c0_33 = arith.constant 0 : index
    %30 = vector.load %arg4[%c0_32, %c0_33] : memref<16x1xf32, #tpu.memory_space<vmem>>, vector<16x1xf32>
    %31 = vector.broadcast %30 : vector<16x1xf32> to vector<16x384xf32>
    %32 = arith.addf %29, %31 : vector<16x384xf32>
    %cst_34 = arith.constant 0.000000e+00 : f32
    %33 = vector.broadcast %cst_34 : f32 to vector<16x384xf32>
    %34 = arith.subf %32, %33 : vector<16x384xf32>
    %cst_35 = arith.constant 3.33333325 : f32
    %35 = vector.broadcast %cst_35 : f32 to vector<16x384xf32>
    %36 = arith.mulf %34, %35 : vector<16x384xf32>
    %cst_36 = arith.constant 1.000000e+00 : f32
    %37 = vector.broadcast %cst_36 : f32 to vector<16x384xf32>
    %38 = arith.subf %37, %32 : vector<16x384xf32>
    %cst_37 = arith.constant 3.33333325 : f32
    %39 = vector.broadcast %cst_37 : f32 to vector<16x384xf32>
    %40 = arith.mulf %38, %39 : vector<16x384xf32>
    %41 = arith.minimumf %36, %40 : vector<16x384xf32>
    %cst_38 = arith.constant 0.000000e+00 : f32
    %42 = vector.broadcast %cst_38 : f32 to vector<16x384xf32>
    %43 = arith.maximumf %41, %42 : vector<16x384xf32>
    %44 = arith.truncf %43 : vector<16x384xf32> to vector<16x384xbf16>
    %c0_39 = arith.constant 0 : index
    %c0_40 = arith.constant 0 : index
    %c0_41 = arith.constant 0 : index
    %45 = vector.load %arg5[%c0_39, %c0_40, %c0_41] : memref<1x16x384xbf16, #tpu.memory_space<vmem>>, vector<1x16x384xbf16>
    %46 = vector.shape_cast %45 : vector<1x16x384xbf16> to vector<16x384xbf16>
    %47 = vector.shape_cast %44 : vector<16x384xbf16> to vector<1x16x384xbf16>
    tpu.vector_store %arg5[%c0_39, %c0_40, %c0_41], %47 {strides = array<i32>} : memref<1x16x384xbf16, #tpu.memory_space<vmem>>, vector<1x16x384xbf16>,
    return
  }
  func.func @transform_0(%arg0: i32, %arg1: i32) -> (i32, i32, i32) {
    %c0_i32 = arith.constant 0 : i32
    %c0_i32_0 = arith.constant 0 : i32
    %c0_i32_1 = arith.constant 0 : i32
    return %arg0, %c0_i32, %c0_i32_0 : i32, i32, i32
  }
  func.func @transform_1(%arg0: i32, %arg1: i32) -> (i32, i32) {
    %c0_i32 = arith.constant 0 : i32
    %c0_i32_0 = arith.constant 0 : i32
    %c0_i32_1 = arith.constant 0 : i32
    return %c0_i32, %c0_i32_0 : i32, i32
  }
  func.func @transform_2(%arg0: i32, %arg1: i32) -> (i32, i32) {
    %c0_i32 = arith.constant 0 : i32
    %c0_i32_0 = arith.constant 0 : i32
    %c0_i32_1 = arith.constant 0 : i32
    return %c0_i32, %c0_i32_0 : i32, i32
  }
  func.func @transform_3(%arg0: i32, %arg1: i32) -> (i32, i32, i32) {
    %c0_i32 = arith.constant 0 : i32
    %c0_i32_0 = arith.constant 0 : i32
    return %arg0, %c0_i32, %arg1 : i32, i32, i32
  }
}

</mosaic_0001>

<bundles_post_ra>
// kernel: fuzzy_conv2d.1
= control target key start
LH: loop header
LB: loop body
LE: loop exit
PB: predicated region body
PF: predicated region fallthrough
CT: control target
= control target key end

     0   :  { %s1142_s12 = smov 0   ;;  %s1144_s13 = smov 0   ;;  %s1299_s0 = inlined_call_operand.vmem [shape: bf16[2,16,512], index: 0, kind: input, shape index: {}]   ;;  %s1300_s1 = inlined_call_operand.vmem [shape: bf16[16,144], index: 1, kind: input, shape index: {}]   ;;  %s1301_s2 = inlined_call_operand.vmem [shape: f32[16,1], index: 2, kind: input, shape index: {}]   ;;  %s1302_s3 = inlined_call_operand.vmem [shape: bf16[2,16,384], index: 3, kind: output, shape index: {}]  }
   0x1   :  { %s1146_s14 = smov 0  }
   0x2 LB: > { %s25_s15 = sadd.s32 1, %s1107_s13  ;;  %p898_p0 = scmp.ge.s32.totalorder %s1111_s14, 1  ;;  %s1111_s14 = sphi %s1146_s14, %s13_s14   ;;  %s1107_s13 = sphi %s1144_s13, %s1304_s13   ;;  %s1103_s12 = sphi %s1142_s12, %s1303_s12  }
   0x3   : > { %p27_p1 = scmp.ge.s32.totalorder %s25_s15, 2  ;;  %p151_p2 = scmp.lt.s32.totalorder %s1111_s14, 3 }
   0x5   : > { %s1306_s15 = smov (%p27_p1, %s25_s15), 0  ;;  %p152_p3 = pnand %p898_p0, %p151_p2 }
   0x6   : > { %p179_p4 = scmp.lt.s32.totalorder (!%p152_p3), %s1103_s12, 1  ;;  %s1113_s20 = smov (!%p152_p3), 91  }
   0x7   : > { %155 = sbr.rel (%p152_p3) target bundleno = 387 (0x183), region = 32  ;;  %s1114_s21 = smov (!%p152_p3), 92  }
   0x8   : > { %s1115_s22 = smov (!%p152_p3), 108   ;;  %s1116_s23 = smov (!%p152_p3), 109  }
   0x9   : > { %s1117_s24 = smov (!%p152_p3), 90   ;;  %s1118_s25 = smov (!%p152_p3), 110  }
   0xa   : > { %s1119_s26 = smov (!%p152_p3), 126   ;;  %s1120_s27 = smov (!%p152_p3), 127  }
   0xc   : > { %s1308_s12 = smov (!%p179_p4, %s1103_s12), 1  ;;  %vm223_vm0 = vcmask 1043456   ;;  %vm400_vm1 = vcmask 752640   ;;  %vm365_vm2 = vcmask 883712   ;;  %vm435_vm3 = vcmask 744448  }
   0xd   : > { %s1023_s16 = sshll.u32 %s1308_s12, 5  ;;  %vm470_vm4 = vcmask 736256   ;;  %vm330_vm5 = vcmask 891904   ;;  %vm295_vm6 = vcmask 900096   ;;  %vm225_vm7 = vcmask 1039360   ;;  %s1053_s17 = smul.u32 24, %s1308_s12 }
   0xe   : > { %s1166_s19 = scalar_lea.vmem %s1299_s0, %s1023_s16  ;;  %vm687_vm8 = vcmask 130048   ;;  %vm260_vm9 = vcmask 1031168  }
   0xf   : > { %v416_v0 = vld [vmem:[%s1166_s19 + $0x10] sm:$0xff]  ;;  %v414_v1 = vld [vmem:[%s1166_s19] sm:$0xff]  ;;  %v417_v2 = vld [vmem:[%s1166_s19 + $0x18] sm:$0xff] }
  0x10   : > { %426 = vrot.lane.b32.xlu1 %v416_v0, %s1113_s20  ;;  %422 = vrot.lane.b32.xlu0 %v414_v1, %s1113_s20  ;;  %199 = vst [vmem:[#allocation2] sm:$0xff] %v414_v1  ;;  %v415_v3 = vld [vmem:[%s1166_s19 + $0x8] sm:$0xff] }
  0x11   : > { %387 = vrot.lane.b32.xlu2 %v414_v1, %s1114_s21  ;;  %201 = vst [vmem:[#allocation2 + $0xc] sm:$0xff] %v416_v0 }
  0x18   : > { %428 = vrot.lane.b32.xlu1 %v417_v2, %s1113_s20  ;;  %424 = vrot.lane.b32.xlu0 %v415_v3, %s1113_s20  ;;  %s1284_s20 = scalar_lea.vmem %s1302_s3, %s1053_s17 }
  0x19   : > { %389 = vrot.lane.b32.xlu2 %v415_v3, %s1114_s21 }
  0x20   : > { %393 = vrot.lane.b32.xlu1 %v417_v2, %s1114_s21  ;;  %391 = vrot.lane.b32.xlu0 %v416_v0, %s1114_s21 }
  0x21   : > { %352 = vrot.lane.b32.xlu2 %v414_v1, %s1115_s22 }
  0x28   : > { %356 = vrot.lane.b32.xlu1 %v416_v0, %s1115_s22  ;;  %354 = vrot.lane.b32.xlu0 %v415_v3, %s1115_s22 }
  0x29   : > { %358 = vrot.lane.b32.xlu2 %v417_v2, %s1115_s22 }
  0x30   : > { %319 = vrot.lane.b32.xlu1 %v415_v3, %s1116_s23  ;;  %317 = vrot.lane.b32.xlu0 %v414_v1, %s1116_s23 }
  0x31   : > { %321 = vrot.lane.b32.xlu2 %v416_v0, %s1116_s23 }
  0x38   : > { %457 = vrot.lane.b32.xlu1 %v414_v1, %s1117_s24  ;;  %323 = vrot.lane.b32.xlu0 %v417_v2, %s1116_s23 }
  0x39   : > { %459 = vrot.lane.b32.xlu2 %v415_v3, %s1117_s24 }
  0x40   : > { %463 = vrot.lane.b32.xlu1 %v417_v2, %s1117_s24  ;;  %461 = vrot.lane.b32.xlu0 %v416_v0, %s1117_s24 }
  0x41   : > { %282 = vrot.lane.b32.xlu2 %v414_v1, %s1118_s25 }
  0x48   : > { %286 = vrot.lane.b32.xlu1 %v416_v0, %s1118_s25  ;;  %284 = vrot.lane.b32.xlu0 %v415_v3, %s1118_s25 }
  0x49   : > { %288 = vrot.lane.b32.xlu2 %v417_v2, %s1118_s25 }
  0x50   : > { %249 = vrot.lane.b32.xlu1 %v415_v3, %s1119_s26  ;;  %247 = vrot.lane.b32.xlu0 %v414_v1, %s1119_s26 }
  0x51   : > { %251 = vrot.lane.b32.xlu2 %v416_v0, %s1119_s26 }
  0x58   : > { %253 = vrot.lane.b32.xlu0 %v417_v2, %s1119_s26  ;;  %211 = vrot.lane.b32.xlu1 %v414_v1, %s1120_s27 }
  0x59   : > { %213 = vrot.lane.b32.xlu2 %v415_v3, %s1120_s27 }
  0x60   : > { %215 = vrot.lane.b32.xlu0 %v416_v0, %s1120_s27  ;;  %217 = vrot.lane.b32.xlu1 %v417_v2, %s1120_s27 }
  0x6b   : > { %v388_v4 = vpop.permute.xlu2 %387 }
  0x6c   : > { %v395_v5 = vrot.slane %v388_v4, 4 }
  0x73   : > { %v390_v6 = vpop.permute.xlu2 %389 }
  0x74   : > { %v396_v7 = vrot.slane %v390_v6, 4 }
  0x76   : > { %v399_v8 = vsel %vm223_vm0, %v395_v5, %v396_v7  ;;  %v402_v9 = vsel %vm400_vm1, %v390_v6, %v396_v7 }
  0x77   : > { %v401_v10 = vsel %vm400_vm1, %v388_v4, %v399_v8  ;;  %411 = vst [vmem:[#allocation2 + $0x98] sm:$0xf] %v402_v9 }
  0x78   : > { %410 = vst [vmem:[#allocation2 + $0x90] sm:$0xff] %v401_v10 }
  0x7b   : > { %v353_v11 = vpop.permute.xlu2 %352 }
  0x7c   : > { %v360_v46 = vrot.slane %v353_v11, 4 }
  0x7f   : > { %v984_v55 = vld [vmem:[#allocation2 + $0x90] sm:$0xf]  ;;  %v1044_v56 = vld [vmem:[#allocation2 + $0x94] sm:$0xf] }
  0x82   : > { %v427_v12 = vpop.permute.xlu1 %426  ;;  %v423_v13 = vpop.permute.xlu0 %422 }
  0x83   : > { %v359_v14 = vpop.permute.xlu2 %358  ;;  %v432_v19 = vrot.slane %v427_v12, 4  ;;  %v430_v20 = vrot.slane %v423_v13, 4 }
  0x84   : > { %v363_v15 = vrot.slane %v359_v14, 4 }
  0x86   : > { %v370_v16 = vsel %vm365_vm2, %v359_v14, %v363_v15 }
  0x87   : > { %378 = vst [vmem:[#allocation2 + $0x8c] sm:$0xf] %v370_v16 }
  0x8a   : > { %v429_v17 = vpop.permute.xlu1 %428  ;;  %v425_v18 = vpop.permute.xlu0 %424 }
  0x8b   : > { %v433_v21 = vrot.slane %v429_v17, 4  ;;  %v431_v22 = vrot.slane %v425_v18, 4  ;;  %v1176_v23 = vpop.permute.xlu2 %321 }
  0x8d   : > { %v438_v24 = vsel %vm223_vm0, %v432_v19, %v433_v21  ;;  %v440_v25 = vsel %vm435_vm3, %v429_v17, %v433_v21  ;;  %v434_v26 = vsel %vm223_vm0, %v430_v20, %v431_v22  ;;  %v437_v29 = vsel %vm435_vm3, %v425_v18, %v431_v22 }
  0x8e   : > { %v439_v27 = vsel %vm435_vm3, %v427_v12, %v438_v24  ;;  %448 = vst [vmem:[#allocation2 + $0xbc] sm:$0xf] %v440_v25  ;;  %v436_v28 = vsel %vm435_vm3, %v423_v13, %v434_v26 }
  0x8f   : > { %447 = vst [vmem:[#allocation2 + $0xb4] sm:$0xff] %v439_v27 }
  0x90   : > { %445 = vst [vmem:[#allocation2 + $0xa8] sm:$0xff] %v436_v28 }
  0x91   : > { %446 = vst [vmem:[#allocation2 + $0xb0] sm:$0xf] %v437_v29 }
  0x92   : > { %v394_v30 = vpop.permute.xlu1 %393  ;;  %v392_v31 = vpop.permute.xlu0 %391 }
  0x93   : > { %v398_v32 = vrot.slane %v394_v30, 4  ;;  %v397_v33 = vrot.slane %v392_v31, 4  ;;  %v1180_v34 = vpop.permute.xlu2 %459 }
  0x94   : > { %v466_v35 = vrot.slane %v1180_v34, 4 }
  0x95   : > { %v405_v36 = vsel %vm400_vm1, %v394_v30, %v398_v32  ;;  %v403_v37 = vsel %vm223_vm0, %v397_v33, %v398_v32 }
  0x96   : > { %413 = vst [vmem:[#allocation2 + $0xa4] sm:$0xf] %v405_v36  ;;  %v404_v38 = vsel %vm400_vm1, %v392_v31, %v403_v37  ;;  %v1048_v39 = vld [vmem:[#allocation2 + $0xb0] sm:$0xf0]  ;;  %v998_v40 = vld [vmem:[#allocation2 + $0xb4] sm:$0xf0]  ;;  %v472_v41 = vsel %vm470_vm4, %v1180_v34, %v466_v35 }
  0x97   : > { %412 = vst [vmem:[#allocation2 + $0x9c] sm:$0xff] %v404_v38  ;;  %v996_v42 = vld [vmem:[#allocation2 + $0xa8] sm:$0xf]  ;;  %v1047_v43 = vld [vmem:[#allocation2 + $0xac] sm:$0xf] }
  0x98   : > { %v997_v44 = vor.u32 %v1048_v39, %v996_v42  ;;  %v1001_v45 = vor.u32 %v1047_v43, %v998_v40  ;;  %481 = vst [vmem:[#allocation2 + $0xc8] sm:$0xf] %v472_v41 }
  0x9a   : > { %691 = vmatpush.bf16.msra.mxu0 %v997_v44  ;;  %719 = vmatpush.bf16.msra.mxu2 %v1001_v45  ;;  %v357_v47 = vpop.permute.xlu1 %356  ;;  %v355_v48 = vpop.permute.xlu0 %354 }
  0x9b   : > { %v362_v49 = vrot.slane %v357_v47, 4  ;;  %v361_v50 = vrot.slane %v355_v48, 4  ;;  %v1190_v51 = vpop.permute.xlu2 %282 }
  0x9c   : > { %v290_v42 = vrot.slane %v1190_v51, 4 }
  0x9d   : > { %v364_v52 = vsel %vm223_vm0, %v360_v46, %v361_v50  ;;  %v367_v53 = vsel %vm365_vm2, %v355_v48, %v361_v50  ;;  %v368_v54 = vsel %vm223_vm0, %v362_v49, %v363_v15  ;;  %v327_v15 = vrot.slane %v1176_v23, 4  ;;  %v1049_v48 = vld [vmem:[#allocation2 + $0xb8] sm:$0xf0]  ;;  %v1024_v49 = vld [vmem:[%s1300_s1 + $0x4] sm:$0xf] }
  0x9e   : > { %v366_v57 = vsel %vm365_vm2, %v353_v11, %v364_v52  ;;  %376 = vst [vmem:[#allocation2 + $0x80] sm:$0xf] %v367_v53  ;;  %v369_v58 = vsel %vm365_vm2, %v357_v47, %v368_v54  ;;  %v1045_v59 = vld [vmem:[#allocation2 + $0x98] sm:$0xf0]  ;;  %v986_v60 = vld [vmem:[#allocation2 + $0x9c] sm:$0xf0] }
  0x9f   : > { %375 = vst [vmem:[#allocation2 + $0x78] sm:$0xff] %v366_v57  ;;  %v985_v61 = vor.u32 %v1045_v59, %v984_v55  ;;  %v989_v62 = vor.u32 %v1044_v56, %v986_v60  ;;  %v1004_v47 = vld [vmem:[#allocation2 + $0xb0] sm:$0xf]  ;;  %v906_v50 = vld [vmem:[%s1300_s1 + $0x8] sm:$0xf0] }
  0xa0   : > { %377 = vst [vmem:[#allocation2 + $0x84] sm:$0xff] %v369_v58  ;;  %v196_v54 = vld [vmem:[%s1166_s19 + $0x8] sm:$0xf]  ;;  %v198_v59 = vld [vmem:[%s1166_s19 + $0x18] sm:$0xf] }
  0xa1   : > { %692 = vmatpush.bf16.msra.mxu0 %v985_v61  ;;  %720 = vmatpush.bf16.msra.mxu2 %v989_v62  ;;  %200 = vst [vmem:[#allocation2 + $0x8] sm:$0xf] %v196_v54 }
  0xa2   : > { %v320_v63 = vpop.permute.xlu1 %319  ;;  %v318_v0 = vpop.permute.xlu0 %317  ;;  %202 = vst [vmem:[#allocation2 + $0x14] sm:$0xf] %v198_v59 }
  0xa3   : > { %v326_v1 = vrot.slane %v320_v63, 4  ;;  %v325_v2 = vrot.slane %v318_v0, 4  ;;  %v1197_v3 = vpop.permute.xlu2 %288 }
  0xa4   : > { %v293_v4 = vrot.slane %v1197_v3, 4 }
  0xa5   : > { %v332_v5 = vsel %vm330_vm5, %v320_v63, %v326_v1  ;;  %v329_v6 = vsel %vm223_vm0, %v325_v2, %v326_v1  ;;  %v1016_v2 = vld [vmem:[#allocation2 + $0xc8] sm:$0xf] }
  0xa6   : > { %341 = vst [vmem:[#allocation2 + $0x68] sm:$0xf] %v332_v5  ;;  %v331_v7 = vsel %vm330_vm5, %v318_v0, %v329_v6  ;;  %v972_v8 = vld [vmem:[#allocation2 + $0x78] sm:$0xf]  ;;  %v1041_v9 = vld [vmem:[#allocation2 + $0x7c] sm:$0xf]  ;;  %v300_v10 = vsel %vm295_vm6, %v1197_v3, %v293_v4  ;;  %v1005_v5 = vor.u32 %v1049_v48, %v1004_v47  ;;  %v1245_v6 = vor.u32 %v1024_v49, %v906_v50 }
  0xa7   : > { %340 = vst [vmem:[#allocation2 + $0x60] sm:$0xff] %v331_v7  ;;  %v1042_v11 = vld [vmem:[#allocation2 + $0x80] sm:$0xf0]  ;;  %v974_v12 = vld [vmem:[#allocation2 + $0x84] sm:$0xf0] }
  0xa8   : > { %v973_v13 = vor.u32 %v1042_v11, %v972_v8  ;;  %v977_v14 = vor.u32 %v1041_v9, %v974_v12  ;;  %308 = vst [vmem:[#allocation2 + $0x5c] sm:$0xf] %v300_v10  ;;  %v992_v10 = vld [vmem:[#allocation2 + $0x98] sm:$0xf] }
  0xaa   : > { %693 = vmatpush.bf16.msra.mxu0 %v973_v13  ;;  %721 = vmatpush.bf16.msra.mxu2 %v977_v14  ;;  %v458_v16 = vpop.permute.xlu1 %457  ;;  %v324_v17 = vpop.permute.xlu0 %323  ;;  %v980_v14 = vld [vmem:[#allocation2 + $0x80] sm:$0xf] }
  0xab   : > { %v465_v18 = vrot.slane %v458_v16, 4  ;;  %v328_v19 = vrot.slane %v324_v17, 4  ;;  %v1208_v20 = vpop.permute.xlu2 %251 }
  0xad   : > { %v469_v21 = vsel %vm223_vm0, %v465_v18, %v466_v35  ;;  %v333_v22 = vsel %vm223_vm0, %v327_v15, %v328_v19  ;;  %v335_v24 = vsel %vm330_vm5, %v324_v17, %v328_v19  ;;  %v1043_v15 = vld [vmem:[#allocation2 + $0x88] sm:$0xf0] }
  0xae   : > { %v471_v25 = vsel %vm470_vm4, %v458_v16, %v469_v21  ;;  %v334_v26 = vsel %vm330_vm5, %v1176_v23, %v333_v22  ;;  %343 = vst [vmem:[#allocation2 + $0x74] sm:$0xf] %v335_v24  ;;  %v960_v23 = vld [vmem:[#allocation2 + $0x60] sm:$0xf]  ;;  %v1038_v36 = vld [vmem:[#allocation2 + $0x64] sm:$0xf] }
  0xaf   : > { %480 = vst [vmem:[#allocation2 + $0xc0] sm:$0xff] %v471_v25  ;;  %v257_v25 = vrot.slane %v1208_v20, 4 }
  0xb0   : > { %342 = vst [vmem:[#allocation2 + $0x6c] sm:$0xff] %v334_v26  ;;  %v981_v26 = vor.u32 %v1043_v15, %v980_v14 }
  0xb2   : > { %v464_v27 = vpop.permute.xlu1 %463  ;;  %v462_v28 = vpop.permute.xlu0 %461 }
  0xb3   : > { %v468_v29 = vrot.slane %v464_v27, 4  ;;  %v467_v30 = vrot.slane %v462_v28, 4  ;;  %v1218_v31 = vpop.permute.xlu2 %213 }
  0xb4   : > { %v220_v32 = vrot.slane %v1218_v31, 4 }
  0xb5   : > { %v475_v33 = vsel %vm470_vm4, %v464_v27, %v468_v29  ;;  %v473_v34 = vsel %vm223_vm0, %v467_v30, %v468_v29  ;;  %v523_v27 = vld [vmem:[%s1301_s2 + $0x8] sm:$0xff]  ;;  %v1040_v30 = vld [vmem:[#allocation2 + $0x70] sm:$0xf0] }
  0xb6   : > { %483 = vst [vmem:[#allocation2 + $0xd4] sm:$0xf] %v475_v33  ;;  %v474_v35 = vsel %vm470_vm4, %v462_v28, %v473_v34  ;;  %v227_v37 = vsel %vm225_vm7, %v1218_v31, %v220_v32  ;;  %v1008_v52 = vld [vmem:[#allocation2 + $0xc0] sm:$0xf]  ;;  %v1050_v53 = vld [vmem:[#allocation2 + $0xc4] sm:$0xf] }
  0xb7   : > { %482 = vst [vmem:[#allocation2 + $0xcc] sm:$0xff] %v474_v35  ;;  %v1039_v38 = vld [vmem:[#allocation2 + $0x68] sm:$0xf0]  ;;  %v962_v39 = vld [vmem:[#allocation2 + $0x6c] sm:$0xf0]  ;;  %v522_v33 = vld [vmem:[%s1301_s2] sm:$0xff] }
  0xb8   : > { %v961_v40 = vor.u32 %v1039_v38, %v960_v23  ;;  %v965_v41 = vor.u32 %v1038_v36, %v962_v39  ;;  %236 = vst [vmem:[#allocation2 + $0x20] sm:$0xf] %v227_v37  ;;  %v1121_v23 = vmov 0   ;;  %v968_v36 = vld [vmem:[#allocation2 + $0x68] sm:$0xf] }
  0xb9   : > { %1088 = vset.pattern.permute.xlu0 %v1121_v23  ;;  %1087 = vset.pattern.permute.xlu2 %v1121_v23 }
  0xba   : > { %694 = vmatpush.bf16.msra.mxu0 %v961_v40  ;;  %722 = vmatpush.bf16.msra.mxu2 %v965_v41  ;;  %v287_v43 = vpop.permute.xlu1 %286  ;;  %v285_v44 = vpop.permute.xlu0 %284  ;;  %v969_v40 = vor.u32 %v1040_v30, %v968_v36 }
  0xbb   : > { %v292_v45 = vrot.slane %v287_v43, 4  ;;  %v291_v46 = vrot.slane %v285_v44, 4  ;;  %531 = vperm.xlu0 %1088, %v523_v27   ;;  %526 = vperm.xlu2 %1087, %v522_v33  }
  0xbd   : > { %v294_v55 = vsel %vm223_vm0, %v290_v42, %v291_v46  ;;  %v297_v56 = vsel %vm295_vm6, %v285_v44, %v291_v46  ;;  %v298_v57 = vsel %vm223_vm0, %v292_v45, %v293_v4  ;;  %v1052_v58 = vld [vmem:[#allocation2 + $0xd0] sm:$0xf0]  ;;  %v1046_v4 = vld [vmem:[#allocation2 + $0xa0] sm:$0xf0]  ;;  %v1037_v44 = vld [vmem:[#allocation2 + $0x58] sm:$0xf0] }
  0xbe   : > { %v296_v60 = vsel %vm295_vm6, %v1190_v51, %v294_v55  ;;  %306 = vst [vmem:[#allocation2 + $0x50] sm:$0xf] %v297_v56  ;;  %v299_v61 = vsel %vm295_vm6, %v287_v43, %v298_v57  ;;  %v1051_v62 = vld [vmem:[#allocation2 + $0xc8] sm:$0xf0]  ;;  %v1010_v63 = vld [vmem:[#allocation2 + $0xcc] sm:$0xf0]  ;;  %v1017_v3 = vor.u32 %v1052_v58, %v1016_v2  ;;  %v993_v11 = vor.u32 %v1046_v4, %v992_v10 }
  0xbf   : > { %305 = vst [vmem:[#allocation2 + $0x48] sm:$0xff] %v296_v60  ;;  %v1009_v0 = vor.u32 %v1051_v62, %v1008_v52  ;;  %v1013_v1 = vor.u32 %v1050_v53, %v1010_v63  ;;  %v932_v60 = vld [vmem:[#allocation2 + $0x20] sm:$0xf]  ;;  %v1027_v63 = vld [vmem:[#allocation2 + $0x8] sm:$0xf0] }
  0xc0   : > { %307 = vst [vmem:[#allocation2 + $0x54] sm:$0xff] %v299_v61  ;;  %v920_v61 = vld [vmem:[#allocation2 + $0x8] sm:$0xf]  ;;  %v912_v62 = vld [vmem:[#allocation2] sm:$0xf] }
  0xc1   : > { %712 = vmatpush.bf16.msra.mxu1 %v1009_v0  ;;  %740 = vmatpush.bf16.msra.mxu3 %v1013_v1  ;;  %v1026_v0 = vld [vmem:[#allocation2 + $0x4] sm:$0xf]  ;;  %v914_v1 = vld [vmem:[#allocation2 + $0xc] sm:$0xf0] }
  0xc2   : > { %v250_v51 = vpop.permute.xlu1 %249  ;;  %v248_v7 = vpop.permute.xlu0 %247  ;;  %v917_v14 = vor.u32 %v1026_v0, %v914_v1 }
  0xc3   : > { %v256_v8 = vrot.slane %v250_v51, 4  ;;  %v255_v9 = vrot.slane %v248_v7, 4 }
  0xc4   : > { %1019 = vmatmul.msk.bf16.vlgmr.msra.gmra.mxu3 %vm687_vm8, %v1245_v6  ;;  %1018 = vmatmul.msk.bf16.vlgmr.msra.gmra.mxu1 %vm687_vm8, %v1245_v6 }
  0xc5   : > { %747 = vmatpush.bf16.msrb.mxu1 %v1005_v5  ;;  %768 = vmatpush.bf16.msrb.mxu3 %v1017_v3  ;;  %v262_v12 = vsel %vm260_vm9, %v250_v51, %v256_v8  ;;  %v259_v13 = vsel %vm223_vm0, %v255_v9, %v256_v8  ;;  %v956_v43 = vld [vmem:[#allocation2 + $0x50] sm:$0xf]  ;;  %v1028_v3 = vld [vmem:[#allocation2 + $0x10] sm:$0xf0] }
  0xc6   : > { %271 = vst [vmem:[#allocation2 + $0x38] sm:$0xf] %v262_v12  ;;  %v261_v16 = vsel %vm260_vm9, %v248_v7, %v259_v13  ;;  %v948_v17 = vld [vmem:[#allocation2 + $0x48] sm:$0xf]  ;;  %v1035_v18 = vld [vmem:[#allocation2 + $0x4c] sm:$0xf]  ;;  %v957_v45 = vor.u32 %v1037_v44, %v956_v43  ;;  %v921_v10 = vor.u32 %v1028_v3, %v920_v61  ;;  %v913_v13 = vor.u32 %v1027_v63, %v912_v62 }
  0xc7   : > { %270 = vst [vmem:[#allocation2 + $0x30] sm:$0xff] %v261_v16  ;;  %v1036_v19 = vld [vmem:[#allocation2 + $0x50] sm:$0xf0]  ;;  %v950_v21 = vld [vmem:[#allocation2 + $0x54] sm:$0xf0] }
  0xc8   : > { %v949_v22 = vor.u32 %v1036_v19, %v948_v17  ;;  %v953_v24 = vor.u32 %v1035_v18, %v950_v21  ;;  %v1025_v12 = vld [vmem:[%s1300_s1 + $0x4] sm:$0xf0] }
  0xc9   : > { %748 = vmatpush.bf16.msrb.mxu1 %v993_v11  ;;  %v904_v11 = vld [vmem:[%s1300_s1] sm:$0xf] }
  0xca   : > { %695 = vmatpush.bf16.msra.mxu0 %v949_v22  ;;  %723 = vmatpush.bf16.msra.mxu2 %v953_v24  ;;  %v254_v28 = vpop.permute.xlu0 %253  ;;  %v212_v29 = vpop.permute.xlu1 %211  ;;  %v905_v15 = vor.u32 %v1025_v12, %v904_v11 }
  0xcb   : > { %v258_v34 = vrot.slane %v254_v28, 4  ;;  %v219_v35 = vrot.slane %v212_v29, 4 }
  0xcd   : > { %749 = vmatpush.bf16.msrb.mxu1 %v981_v26  ;;  %v263_v37 = vsel %vm223_vm0, %v257_v25, %v258_v34  ;;  %v265_v38 = vsel %vm260_vm9, %v254_v28, %v258_v34  ;;  %v224_v39 = vsel %vm223_vm0, %v219_v35, %v220_v32  ;;  %v944_v32 = vld [vmem:[#allocation2 + $0x38] sm:$0xf] }
  0xce   : > { %v264_v41 = vsel %vm260_vm9, %v1208_v20, %v263_v37  ;;  %273 = vst [vmem:[#allocation2 + $0x44] sm:$0xf] %v265_v38  ;;  %v226_v42 = vsel %vm225_vm7, %v212_v29, %v224_v39  ;;  %v936_v52 = vld [vmem:[#allocation2 + $0x30] sm:$0xf]  ;;  %v1032_v53 = vld [vmem:[#allocation2 + $0x34] sm:$0xf] }
  0xcf   : > { %272 = vst [vmem:[#allocation2 + $0x3c] sm:$0xff] %v264_v41 }
  0xd0   : > { %235 = vst [vmem:[#allocation2 + $0x18] sm:$0xff] %v226_v42 }
  0xd1   : > { %750 = vmatpush.bf16.msrb.mxu1 %v969_v40 }
  0xd2   : > { %v216_v46 = vpop.permute.xlu0 %215  ;;  %v218_v47 = vpop.permute.xlu1 %217 }
  0xd3   : > { %v221_v31 = vrot.slane %v216_v46, 4  ;;  %v222_v48 = vrot.slane %v218_v47, 4 }
  0xd4   : > { %1020 = vmatmul.msk.bf16.vlgmr.msrb.gmra.mxu3 %vm687_vm8, %v1245_v6 }
  0xd5   : > { %751 = vmatpush.bf16.msrb.mxu1 %v957_v45  ;;  %v228_v20 = vsel %vm223_vm0, %v221_v31, %v222_v48  ;;  %v230_v49 = vsel %vm225_vm7, %v218_v47, %v222_v48  ;;  %v1034_v50 = vld [vmem:[#allocation2 + $0x40] sm:$0xf0] }
  0xd6   : > { %v229_v54 = vsel %vm225_vm7, %v216_v46, %v228_v20  ;;  %238 = vst [vmem:[#allocation2 + $0x2c] sm:$0xf] %v230_v49  ;;  %v945_v55 = vor.u32 %v1034_v50, %v944_v32  ;;  %v1033_v56 = vld [vmem:[#allocation2 + $0x38] sm:$0xf0]  ;;  %v938_v57 = vld [vmem:[#allocation2 + $0x3c] sm:$0xf0] }
  0xd7   : > { %237 = vst [vmem:[#allocation2 + $0x24] sm:$0xff] %v229_v54  ;;  %v937_v58 = vor.u32 %v1033_v56, %v936_v52  ;;  %v941_v59 = vor.u32 %v1032_v53, %v938_v57  ;;  %v924_v5 = vld [vmem:[#allocation2 + $0x18] sm:$0xf]  ;;  %v1029_v51 = vld [vmem:[#allocation2 + $0x1c] sm:$0xf] }
  0xd9   : > { %752 = vmatpush.bf16.msrb.mxu1 %v945_v55  ;;  %696 = vmatpush.bf16.msra.mxu0 %v937_v58 }
  0xda   : > { %724 = vmatpush.bf16.msra.mxu2 %v941_v59 }
  0xdd   : > { %v1031_v2 = vld [vmem:[#allocation2 + $0x28] sm:$0xf0] }
  0xde   : > { %v933_v6 = vor.u32 %v1031_v2, %v932_v60  ;;  %v1030_v4 = vld [vmem:[#allocation2 + $0x20] sm:$0xf0]  ;;  %v926_v7 = vld [vmem:[#allocation2 + $0x24] sm:$0xf0] }
  0xdf   : > { %v925_v8 = vor.u32 %v1030_v4, %v924_v5  ;;  %v929_v9 = vor.u32 %v1029_v51, %v926_v7 }
  0xe0   : > { %753 = vmatpush.bf16.msrb.mxu1 %v933_v6 }
  0xe1   : > { %697 = vmatpush.bf16.msra.mxu0 %v925_v8  ;;  %725 = vmatpush.bf16.msra.mxu2 %v929_v9 }
  0xe4   : > { %754 = vmatpush.bf16.msrb.mxu1 %v921_v10 }
  0xe5   : > { %698 = vmatpush.bf16.msra.mxu0 %v913_v13  ;;  %726 = vmatpush.bf16.msra.mxu2 %v917_v14 }
  0xe7   : > { %755 = vmatmul.bf16.vlgmr.msrb.gmra.mxu1 %v905_v15 }
  0xe8   : > { %699 = vmatmul.bf16.vlgmr.msra.gmra.mxu0 %v905_v15  ;;  %727 = vmatmul.bf16.vlgmr.msra.gmra.mxu2 %v905_v15 }
 0x115   : > { %v527_v22 = vpop.permute.xlu2 %526 }
 0x12d   : > { %v532_v35 = vpop.permute.xlu0 %531 }
 0x141   : > { %v714_v17 = vpop.f32.mrf.mxu1 }
 0x147   : > { %v742_v16 = vpop.f32.mrf.mxu3 }
 0x149   : > { %v716_v19 = vpop.f32.mrf.mxu1 }
 0x14f   : > { %v744_v18 = vpop.f32.mrf.mxu3 }
 0x157   : > { %v770_v21 = vpop.f32.mrf.mxu3 }
 0x15f   : > { %v772_v39 = vpop.f32.mrf.mxu3 }
 0x164   : > { %v756_v24 = vpop.f32.mrf.mxu1 }
 0x165   : > { %v757_v25 = vadd.f32 %v756_v24, %v527_v22  ;;  %v700_v26 = vpop.f32.mrf.mxu0 }
 0x166   : > { %v701_v27 = vadd.f32 %v700_v26, %v527_v22 }
 0x167   : > { %v771_v28 = vadd.f32 %v770_v21, %v757_v25 }
 0x168   : > { %v715_v29 = vadd.f32 %v714_v17, %v701_v27 }
 0x169   : > { %v777_v30 = vmul.f32 3.3333333, %v771_v28  ;;  %v783_v33 = vsub.f32 1.0, %v771_v28 }
 0x16a   : > { %v781_v34 = vsub.f32 1.0, %v715_v29  ;;  %v775_v31 = vmul.f32 3.3333333, %v715_v29 }
 0x16b   : > { %v789_v23 = vmul.f32 3.3333333, %v783_v33  ;;  %v728_v36 = vpop.f32.mrf.mxu2 }
 0x16c   : > { %v729_v37 = vadd.f32 %v728_v36, %v527_v22  ;;  %v758_v38 = vpop.f32.mrf.mxu1  ;;  %v787_v43 = vmul.f32 3.3333333, %v781_v34 }
 0x16d   : > { %v795_v40 = vmin.f32 %v777_v30, %v789_v23  ;;  %v759_v41 = vadd.f32 %v758_v38, %v532_v35  ;;  %v702_v42 = vpop.f32.mrf.mxu0 }
 0x16e   : > { %v743_v44 = vadd.f32 %v742_v16, %v729_v37  ;;  %v703_v45 = vadd.f32 %v702_v42, %v532_v35  ;;  %v793_v50 = vmin.f32 %v775_v31, %v787_v43 }
 0x16f   : > { %v801_v46 = vmax.f32 %v795_v40, 0.0  ;;  %v773_v47 = vadd.f32 %v772_v39, %v759_v41 }
 0x170   : > { %v782_v48 = vsub.f32 1.0, %v743_v44  ;;  %v717_v32 = vadd.f32 %v716_v19, %v703_v45  ;;  %v776_v52 = vmul.f32 3.3333333, %v743_v44  ;;  %v799_v61 = vmax.f32 %v793_v50, 0.0 }
 0x171   : > { %v806_v20 = vpack.c.bf16 %v801_v46, %v801_v46  ;;  %v786_v49 = vsub.f32 1.0, %v773_v47  ;;  %v780_v55 = vmul.f32 3.3333333, %v773_v47 }
 0x172   : > { %v788_v53 = vmul.f32 3.3333333, %v782_v48  ;;  %v784_v54 = vsub.f32 1.0, %v717_v32  ;;  %v778_v5 = vmul.f32 3.3333333, %v717_v32 }
 0x173   : > { %810 = vst [vmem:[%s1284_s20 + $0x8] sm:$0xf] %v806_v20  ;;  %v792_v56 = vmul.f32 3.3333333, %v786_v49  ;;  %v730_v57 = vpop.f32.mrf.mxu2 }
 0x174   : > { %v794_v58 = vmin.f32 %v776_v52, %v788_v53  ;;  %v731_v59 = vadd.f32 %v730_v57, %v532_v35  ;;  %v790_v63 = vmul.f32 3.3333333, %v784_v54 }
 0x175   : > { %v798_v60 = vmin.f32 %v780_v55, %v792_v56 }
 0x176   : > { %v800_v62 = vmax.f32 %v794_v58, 0.0  ;;  %v745_v0 = vadd.f32 %v744_v18, %v731_v59  ;;  %v796_v4 = vmin.f32 %v778_v5, %v790_v63 }
 0x177   : > { %v804_v1 = vmax.f32 %v798_v60, 0.0 }
 0x178   : > { %v805_v2 = vpack.c.bf16 %v800_v62, %v799_v61  ;;  %v785_v3 = vsub.f32 1.0, %v745_v0  ;;  %v779_v51 = vmul.f32 3.3333333, %v745_v0  ;;  %v802_v9 = vmax.f32 %v796_v4, 0.0 }
 0x179   : > { %v808_v6 = vpack.c.bf16 %v804_v1, %v804_v1 }
 0x17a   : > { %809 = vst [vmem:[%s1284_s20] sm:$0xff] %v805_v2  ;;  %v791_v7 = vmul.f32 3.3333333, %v785_v3 }
 0x17b   : > { %812 = vst [vmem:[%s1284_s20 + $0x14] sm:$0xf] %v808_v6 }
 0x17c   : > { %v797_v8 = vmin.f32 %v779_v51, %v791_v7 }
 0x17e   : > { %v803_v10 = vmax.f32 %v797_v8, 0.0 }
 0x180   : > { %v807_v11 = vpack.c.bf16 %v803_v10, %v802_v9 }
 0x182   : > { %811 = vst [vmem:[%s1284_s20 + $0xc] sm:$0xff] %v807_v11 }
 0x183 PF: > { %s13_s14 = sadd.s32 1, %s1111_s14   ;;  %s1303_s12 = smov %s1107_s13 }
 0x184   : > { %p10_p5 = scmp.ge.s32.totalorder %s13_s14, 4   ;;  %s1304_s13 = smov %s1306_s15 }
 0x186   :  { %12 = sbr.rel (!%p10_p5) target bundleno = 2 (0x2), region = 62 }

</bundles_post_ra>
